<compile_context>
chip_gen: v7x
topology: tpu7x:2x2x1
jax: 0.10.0
libtpu: 0.0.40
codegen_flags: <defaults>
</compile_context>

<pallas_src>
import jax
import jax.numpy as jnp
from jax.experimental import pallas as pl
from jax.experimental.pallas import tpu as pltpu

_INV_SQRT2 = 0.7071067811865476


def _round_up(a, b):
    return ((a + b - 1) // b) * b


def _gelu_exact(h):
    # Exact erf-based GELU, matching PyTorch nn.GELU() default.
    return 0.5 * h * (1.0 + jax.lax.erf(h * _INV_SQRT2))


# --------------------------------------------------------------------------- kernels
def _ffn_resident_kernel(x_ref, w1_ref, b1_ref, w2_ref, b2_ref, o_ref):
    # Weights fully resident in VMEM (constant index_map -> DMA'd once).
    xb = x_ref[...].astype(w1_ref.dtype)
    h = jnp.dot(xb, w1_ref[...], preferred_element_type=jnp.float32) + b1_ref[...]
    h = _gelu_exact(h)
    out = jnp.dot(h.astype(w2_ref.dtype), w2_ref[...],
                  preferred_element_type=jnp.float32)
    o_ref[...] = (out + b2_ref[...]).astype(o_ref.dtype)


def _make_stream_kernel(acc_in_out):
    if acc_in_out:
        # float32 output: accumulate directly into the resident output block.
        def kernel(x_ref, w1_ref, b1_ref, w2_ref, b2_ref, o_ref):
            h_idx = pl.program_id(1)
            xb = x_ref[...].astype(w1_ref.dtype)
            h = jnp.dot(xb, w1_ref[...], preferred_element_type=jnp.float32)
            h = _gelu_exact(h + b1_ref[...])
            contrib = jnp.dot(h.astype(w2_ref.dtype), w2_ref[...],
                              preferred_element_type=jnp.float32)

            @pl.when(h_idx == 0)
            def _():
                o_ref[...] = contrib + b2_ref[...]

            @pl.when(h_idx != 0)
            def _():
                o_ref[...] = o_ref[...] + contrib

        return kernel

    def kernel(x_ref, w1_ref, b1_ref, w2_ref, b2_ref, o_ref, acc_ref):
        h_idx = pl.program_id(1)

        @pl.when(h_idx == 0)
        def _():
            acc_ref[...] = jnp.zeros_like(acc_ref)

        xb = x_ref[...].astype(w1_ref.dtype)
        h = jnp.dot(xb, w1_ref[...], preferred_element_type=jnp.float32)
        h = _gelu_exact(h + b1_ref[...])
        acc_ref[...] += jnp.dot(h.astype(w2_ref.dtype), w2_ref[...],
                                preferred_element_type=jnp.float32)

        @pl.when(h_idx == pl.num_programs(1) - 1)
        def _():
            o_ref[...] = (acc_ref[...] + b2_ref[...]).astype(o_ref.dtype)

    return kernel


# ----------------------------------------------------------------- config / prepare
def _vmem_budget():
    cap = 64 * 1024 * 1024  # conservative fallback (v7x per-TC VMEM)
    try:
        info = pltpu.get_tpu_info()
        cap = int(getattr(info, "vmem_capacity_bytes", cap))
    except Exception:
        pass
    # Never ask for the whole physical VMEM; leave headroom for Mosaic scratch.
    limit = min(int(cap * 0.85), 112 * 1024 * 1024)
    return cap, limit


def prepare_ffn_params(w1, b1, w2, b2, compute_dtype=jnp.bfloat16):
    """Hoisted, one-time cast + lane-dense padding of the FFN parameters.

    Call this once and reuse the result across forward passes so the per-call
    HBM pass over the f32 weights disappears from the hot path.
    w1: [D, H], b1: [H], w2: [H, D], b2: [D].
    """
    D, H = w1.shape
    cap, limit = _vmem_budget()
    small_vmem = cap < (96 << 20)          # v7x-like (64 MiB per TensorCore)

    D_pad = _round_up(D, 128)
    th = min(256 if small_vmem else 512, _round_up(H, 128))
    H_pad = _round_up(_round_up(H, 128), th)

    w1p = w1.astype(compute_dtype)
    w2p = w2.astype(compute_dtype)
    b1p = b1.astype(jnp.float32)
    b2p = b2.astype(jnp.float32)
    if (D_pad, H_pad) != (D, H):
        # Zero padding is exact: padded hidden channels have zero weight + zero bias
        # (GELU(0) == 0) and padded output columns are sliced away.
        w1p = jnp.pad(w1p, ((0, D_pad - D), (0, H_pad - H)))
        w2p = jnp.pad(w2p, ((0, H_pad - H), (0, D_pad - D)))
        b1p = jnp.pad(b1p, ((0, H_pad - H),))
        b2p = jnp.pad(b2p, ((0, D_pad - D),))
    b1p = b1p.reshape(1, H_pad)
    b2p = b2p.reshape(1, D_pad)

    return dict(w1=w1p, b1=b1p, w2=w2p, b2=b2p,
                D=D, H=H, D_pad=D_pad, H_pad=H_pad, th=th,
                vmem_cap=cap, vmem_limit=limit, compute_dtype=compute_dtype)


# ---------------------------------------------------------------------------- apply
def ffn_apply(x, params):
    """x: [B, S, D] -> [B, S, D] using pre-prepared (cast/padded) parameters."""
    B, S, D = x.shape
    assert D == params["D"], "dim mismatch with prepared params"
    D_pad, H_pad, th = params["D_pad"], params["H_pad"], params["th"]
    limit = params["vmem_limit"]
    M = B * S
    out_dtype = x.dtype
    x_itemsize = jnp.dtype(x.dtype).itemsize
    out_itemsize = jnp.dtype(out_dtype).itemsize

    # ---- row-tile selection (16-aligned rows for bf16 packing; megacore >= 2 tiles).
    row_align = 16
    tm_target = 512
    M_al = _round_up(max(M, row_align), row_align)
    tm = min(tm_target, M_al)
    if M_al // tm < 2 and tm >= 2 * row_align:
        tm = _round_up(tm // 2, row_align)
    M_pad = _round_up(M, tm)

    # ---- VMEM footprint estimates (double-buffered blocks + in-flight intermediates).
    w_bytes = 2 * D_pad * H_pad * 2                              # bf16 W1 + W2
    resident_bytes = (2 * tm * D_pad * x_itemsize + 2 * w_bytes
                      + 2 * tm * D_pad * out_itemsize + tm * H_pad * 6
                      + 2 * (H_pad + D_pad) * 4)
    use_resident = resident_bytes <= limit // 2

    def stream_bytes(tm_):
        return (2 * tm_ * D_pad * x_itemsize + 4 * D_pad * th * 2
                + 2 * tm_ * D_pad * out_itemsize + tm_ * D_pad * 4
                + tm_ * th * 6 + 2 * (th + D_pad) * 4)

    if not use_resident:
        while tm > row_align and stream_bytes(tm) > int(0.8 * limit):
            tm = max(row_align, _round_up(tm // 2, row_align))
        M_pad = _round_up(M, tm)

    # ---- activations: keep original dtype (cast inside the kernel); pad only if needed.
    x2d = x.reshape(M, D)
    if (M_pad, D_pad) != (M, D):
        x2d = jnp.pad(x2d, ((0, M_pad - M), (0, D_pad - D)))

    if use_resident:
        out2d = pl.pallas_call(
            _ffn_resident_kernel,
            out_shape=jax.ShapeDtypeStruct((M_pad, D_pad), out_dtype),
            grid_spec=pltpu.PrefetchScalarGridSpec(
                num_scalar_prefetch=0,
                grid=(M_pad // tm,),
                in_specs=[
                    pl.BlockSpec((tm, D_pad), lambda i: (i, 0)),      # x rows tile
                    pl.BlockSpec((D_pad, H_pad), lambda i: (0, 0)),   # W1 (resident)
                    pl.BlockSpec((1, H_pad), lambda i: (0, 0)),       # b1 (resident)
                    pl.BlockSpec((H_pad, D_pad), lambda i: (0, 0)),   # W2 (resident)
                    pl.BlockSpec((1, D_pad), lambda i: (0, 0)),       # b2 (resident)
                ],
                out_specs=pl.BlockSpec((tm, D_pad), lambda i: (i, 0)),
            ),
            compiler_params=pltpu.CompilerParams(
                dimension_semantics=("parallel",),
                vmem_limit_bytes=int(limit),
            ),
        )(x2d, params["w1"], params["b1"], params["w2"], params["b2"])
    else:
        acc_in_out = (out_dtype == jnp.float32)
        kernel = _make_stream_kernel(acc_in_out)
        scratch = [] if acc_in_out else [pltpu.VMEM((tm, D_pad), jnp.float32)]
        out2d = pl.pallas_call(
            kernel,
            out_shape=jax.ShapeDtypeStruct((M_pad, D_pad), out_dtype),
            grid_spec=pltpu.PrefetchScalarGridSpec(
                num_scalar_prefetch=0,
                grid=(M_pad // tm, H_pad // th),
                in_specs=[
                    pl.BlockSpec((tm, D_pad), lambda i, h: (i, 0)),   # x rows tile
                    pl.BlockSpec((D_pad, th), lambda i, h: (0, h)),   # W1 H-tile
                    pl.BlockSpec((1, th), lambda i, h: (0, h)),       # b1 H-tile
                    pl.BlockSpec((th, D_pad), lambda i, h: (h, 0)),   # W2 H-tile
                    pl.BlockSpec((1, D_pad), lambda i, h: (0, 0)),    # b2
                ],
                out_specs=pl.BlockSpec((tm, D_pad), lambda i, h: (i, 0)),
                scratch_shapes=scratch,
            ),
            compiler_params=pltpu.CompilerParams(
                dimension_semantics=("parallel", "arbitrary"),
                vmem_limit_bytes=int(limit),
            ),
        )(x2d, params["w1"], params["b1"], params["w2"], params["b2"])

    if (M_pad, D_pad) != (M, D):
        out2d = out2d[:M, :D]
    return out2d.reshape(B, S, D)


def feed_forward(x, w1, b1, w2, b2):
    """Convenience one-shot API. For repeated calls, hoist prepare_ffn_params()."""
    return ffn_apply(x, prepare_ffn_params(w1, b1, w2, b2))


def _reference(x, w1, b1, w2, b2):
    h = jnp.einsum("bsd,dh->bsh", x, w1) + b1
    h = 0.5 * h * (1.0 + jax.lax.erf(h / jnp.sqrt(2.0)))
    return jnp.einsum("bsh,hd->bsd", h, w2) + b2


if __name__ == "__main__":
    # Small shapes implied by the module: batch=2, seq=8, dim=32, hidden_dim=64
    B, S, D, Hdim = 2, 8, 32, 64

    key = jax.random.PRNGKey(0)
    kx, kw1, kb1, kw2, kb2 = jax.random.split(key, 5)

    x = jax.random.normal(kx, (B, S, D), dtype=jnp.float32)
    # Deterministic synthetic parameters (nn.Linear shapes: W1[D->H], W2[H->D])
    w1 = jax.random.normal(kw1, (D, Hdim), dtype=jnp.float32) * (1.0 / jnp.sqrt(D))
    b1 = jax.random.normal(kb1, (Hdim,), dtype=jnp.float32) * 0.01
    w2 = jax.random.normal(kw2, (Hdim, D), dtype=jnp.float32) * (1.0 / jnp.sqrt(Hdim))
    b2 = jax.random.normal(kb2, (D,), dtype=jnp.float32) * 0.01

    # Hoisted parameter preparation (done once, reused for every forward call).
    params = prepare_ffn_params(w1, b1, w2, b2)
    out = ffn_apply(x, params)
    out = jax.block_until_ready(out)

    ref = _reference(x, w1, b1, w2, b2)
    assert out.shape == (B, S, D)
    # bf16 MXU inputs (f32 accumulation) -> loosened tolerance vs the f32 reference.
    assert jnp.allclose(out, ref, atol=5e-2, rtol=5e-2)

    print("KERNEL_OK")
</pallas_src>

<mosaic_0001>
module attributes {stable_mosaic.version = 11 : i64} {
  func.func @_ffn_resident_kernel(%arg0: i32, %arg1: memref<16x128xf32, #tpu.memory_space<vmem>>, %arg2: memref<128x128xbf16, #tpu.memory_space<vmem>>, %arg3: memref<1x128xf32, #tpu.memory_space<vmem>>, %arg4: memref<128x128xbf16, #tpu.memory_space<vmem>>, %arg5: memref<1x128xf32, #tpu.memory_space<vmem>>, %arg6: memref<16x128xf32, #tpu.memory_space<vmem>>) attributes {dimension_semantics = [#tpu.dimension_semantics<parallel>], iteration_bounds = array<i64: 1>, scalar_prefetch = 0 : i64, scratch_operands = 0 : i64, tpu.core_type = #tpu.core_type<tc>, window_params = [{transform_indices = @transform_0, window_bounds = array<i64: 16, 128>}, {pipeline_mode = #tpu.pipeline_mode<synchronous>, transform_indices = @transform_1, window_bounds = array<i64: 128, 128>}, {pipeline_mode = #tpu.pipeline_mode<synchronous>, transform_indices = @transform_2, window_bounds = array<i64: 1, 128>}, {pipeline_mode = #tpu.pipeline_mode<synchronous>, transform_indices = @transform_3, window_bounds = array<i64: 128, 128>}, {pipeline_mode = #tpu.pipeline_mode<synchronous>, transform_indices = @transform_4, window_bounds = array<i64: 1, 128>}, {transform_indices = @transform_5, window_bounds = array<i64: 16, 128>}]} {
    %c0 = arith.constant 0 : index
    %c0_0 = arith.constant 0 : index
    %0 = vector.load %arg1[%c0, %c0_0] : memref<16x128xf32, #tpu.memory_space<vmem>>, vector<16x128xf32>
    %1 = arith.truncf %0 : vector<16x128xf32> to vector<16x128xbf16>
    %c0_1 = arith.constant 0 : index
    %c0_2 = arith.constant 0 : index
    %2 = vector.load %arg2[%c0_1, %c0_2] : memref<128x128xbf16, #tpu.memory_space<vmem>>, vector<128x128xbf16>
    %cst = arith.constant dense<0.000000e+00> : vector<16x128xf32>
    %3 = tpu.matmul %1, %2, %cst {dimension_numbers = #tpu.dot_dimension_numbers<[1], [0], [0], [1], [0, 0, 1, 1], [], []>} : vector<16x128xbf16>, vector<128x128xbf16>, vector<16x128xf32> -> vector<16x128xf32>
    %c0_3 = arith.constant 0 : index
    %c0_4 = arith.constant 0 : index
    %4 = vector.load %arg3[%c0_3, %c0_4] : memref<1x128xf32, #tpu.memory_space<vmem>>, vector<1x128xf32>
    %5 = vector.broadcast %4 : vector<1x128xf32> to vector<16x128xf32>
    %6 = arith.addf %3, %5 : vector<16x128xf32>
    %cst_5 = arith.constant 5.000000e-01 : f32
    %7 = vector.broadcast %cst_5 : f32 to vector<16x128xf32>
    %8 = arith.mulf %7, %6 : vector<16x128xf32>
    %cst_6 = arith.constant 0.707106769 : f32
    %9 = vector.broadcast %cst_6 : f32 to vector<16x128xf32>
    %10 = arith.mulf %6, %9 : vector<16x128xf32>
    %11 = math.erf %10 : vector<16x128xf32>
    %cst_7 = arith.constant 1.000000e+00 : f32
    %12 = vector.broadcast %cst_7 : f32 to vector<16x128xf32>
    %13 = arith.addf %12, %11 : vector<16x128xf32>
    %14 = arith.mulf %8, %13 : vector<16x128xf32>
    %15 = arith.truncf %14 : vector<16x128xf32> to vector<16x128xbf16>
    %c0_8 = arith.constant 0 : index
    %c0_9 = arith.constant 0 : index
    %16 = vector.load %arg4[%c0_8, %c0_9] : memref<128x128xbf16, #tpu.memory_space<vmem>>, vector<128x128xbf16>
    %cst_10 = arith.constant dense<0.000000e+00> : vector<16x128xf32>
    %17 = tpu.matmul %15, %16, %cst_10 {dimension_numbers = #tpu.dot_dimension_numbers<[1], [0], [0], [1], [0, 0, 1, 1], [], []>} : vector<16x128xbf16>, vector<128x128xbf16>, vector<16x128xf32> -> vector<16x128xf32>
    %c0_11 = arith.constant 0 : index
    %c0_12 = arith.constant 0 : index
    %18 = vector.load %arg5[%c0_11, %c0_12] : memref<1x128xf32, #tpu.memory_space<vmem>>, vector<1x128xf32>
    %19 = vector.broadcast %18 : vector<1x128xf32> to vector<16x128xf32>
    %20 = arith.addf %17, %19 : vector<16x128xf32>
    %c0_13 = arith.constant 0 : index
    %c0_14 = arith.constant 0 : index
    %21 = vector.load %arg6[%c0_13, %c0_14] : memref<16x128xf32, #tpu.memory_space<vmem>>, vector<16x128xf32>
    tpu.vector_store %arg6[%c0_13, %c0_14], %20 {strides = array<i32>} : memref<16x128xf32, #tpu.memory_space<vmem>>, vector<16x128xf32>,
    return
  }
  func.func @transform_0(%arg0: i32) -> (i32, i32) {
    %c0_i32 = arith.constant 0 : i32
    %c0_i32_0 = arith.constant 0 : i32
    return %arg0, %c0_i32 : i32, i32
  }
  func.func @transform_1(%arg0: i32) -> (i32, i32) {
    %c0_i32 = arith.constant 0 : i32
    %c0_i32_0 = arith.constant 0 : i32
    %c0_i32_1 = arith.constant 0 : i32
    return %c0_i32, %c0_i32_0 : i32, i32
  }
  func.func @transform_2(%arg0: i32) -> (i32, i32) {
    %c0_i32 = arith.constant 0 : i32
    %c0_i32_0 = arith.constant 0 : i32
    %c0_i32_1 = arith.constant 0 : i32
    return %c0_i32, %c0_i32_0 : i32, i32
  }
  func.func @transform_3(%arg0: i32) -> (i32, i32) {
    %c0_i32 = arith.constant 0 : i32
    %c0_i32_0 = arith.constant 0 : i32
    %c0_i32_1 = arith.constant 0 : i32
    return %c0_i32, %c0_i32_0 : i32, i32
  }
  func.func @transform_4(%arg0: i32) -> (i32, i32) {
    %c0_i32 = arith.constant 0 : i32
    %c0_i32_0 = arith.constant 0 : i32
    %c0_i32_1 = arith.constant 0 : i32
    return %c0_i32, %c0_i32_0 : i32, i32
  }
  func.func @transform_5(%arg0: i32) -> (i32, i32) {
    %c0_i32 = arith.constant 0 : i32
    %c0_i32_0 = arith.constant 0 : i32
    return %arg0, %c0_i32 : i32, i32
  }
}

</mosaic_0001>

<bundles_post_ra>
// kernel: tpu_custom_call.1
= control target key start
LH: loop header
LB: loop body
LE: loop exit
PB: predicated region body
PF: predicated region fallthrough
CT: control target
= control target key end

     0   :  { %10 = vsyncpa [#allocation3], 0  ;;  %s627_s0 = inlined_call_operand.hbm [shape: f32[16,128], index: 0, kind: input, shape index: {}]   ;;  %s628_s1 = inlined_call_operand.hbm [shape: bf16[128,128], index: 1, kind: input, shape index: {}]   ;;  %s629_s2 = inlined_call_operand.vmem [shape: f32[1,128], index: 2, kind: input, shape index: {}]   ;;  %s630_s3 = inlined_call_operand.hbm [shape: bf16[128,128], index: 3, kind: input, shape index: {}]   ;;  %s631_s4 = inlined_call_operand.vmem [shape: f32[1,128], index: 4, kind: input, shape index: {}]   ;;  %s632_s5 = inlined_call_operand.hbm [shape: f32[16,128], index: 5, kind: output, shape index: {}]  }
   0x1   :  { %11 = vsyncpa [#allocation6], 0 }
   0x2   :  { %12 = vsyncpa [#allocation4], 0  ;;  %s521_s18 = smov [#allocation5]   ;;  %s427_s22 = scalar_lea.hbm %s628_s1, 1024 }
   0x3   :  { %s30_s19 = sshll.u32 %s521_s18, 4  ;;  %p428_p0 = scmp.ne.s32.totalorder %s628_s1, %s427_s22  ;;  %s31_s19 = int_to_ptr.vmem [resolvable:$true] %s30_s19 }
   0x4   :  { %p431_p1 = scmp.lt.u32.totalorder %s427_s22, %s628_s1 }
   0x6   :  { %p433_p2 = pnand %p431_p1, %p428_p0 }
   0x8   :  { %436 = shalt.err (!%p433_p2)
}
   0x9   :  { %s437_s27 = scalar_lea.vmem %s31_s19, 1024  ;;  %p442_p4 = scmp.lt.s32.totalorder %s31_s19, %s31_s19 }
   0xa   :  { %p438_p3 = scmp.ne.s32.totalorder %s31_s19, %s437_s27  ;;  %p443_p5 = scmp.lt.s32.totalorder %s437_s27, %s437_s27 }
   0xc   :  { %p444_p6 = por %p443_p5, %p442_p4 }
   0xe   :  { %p445_p7 = pnand %p444_p6, %p438_p3 }
  0x10   :  { %448 = shalt.err (!%p445_p7)
}
  0x11   :  { %s522_s28 = smov 64   ;;  %s523_s29 = smov 4  }
  0x12   :  { %36 = dma.hbm_to_vmem [thread:$0]  %s628_s1, 1024, %s31_s19, [#allocation6], %s522_s28, %s522_s28, %s523_s29  }
  0x13   :  { %s524_s7 = smov [#allocation2]   ;;  %s449_s11 = scalar_lea.hbm %s627_s0, 256 }
  0x14   :  { %s18_s8 = sshll.u32 %s524_s7, 4  ;;  %p450_p8 = scmp.ne.s32.totalorder %s627_s0, %s449_s11  ;;  %s19_s8 = int_to_ptr.vmem [resolvable:$true] %s18_s8 }
  0x15   :  { %p453_p9 = scmp.lt.u32.totalorder %s449_s11, %s627_s0 }
  0x17   :  { %p455_p10 = pnand %p453_p9, %p450_p8 }
  0x19   :  { %458 = shalt.err (!%p455_p10)
}
  0x1a   :  { %s459_s16 = scalar_lea.vmem %s19_s8, 256  ;;  %p464_p12 = scmp.lt.s32.totalorder %s19_s8, %s19_s8 }
  0x1b   :  { %p460_p11 = scmp.ne.s32.totalorder %s19_s8, %s459_s16  ;;  %p465_p13 = scmp.lt.s32.totalorder %s459_s16, %s459_s16 }
  0x1d   :  { %p466_p0 = por %p465_p13, %p464_p12 }
  0x1f   :  { %p467_p1 = pnand %p466_p0, %p460_p11 }
  0x21   :  { %470 = shalt.err (!%p467_p1)
}
  0x22   :  { %s525_s1 = smov 128   ;;  %s526_s17 = smov 8  }
  0x23   :  { %24 = dma.hbm_to_vmem [thread:$0]  %s627_s0, 256, %s19_s8, [#allocation3], %s525_s1, %s525_s1, %s526_s17  }
  0x24   :  { %s527_s20 = smov [#allocation7]   ;;  %s471_s24 = scalar_lea.hbm %s630_s3, 1024 }
  0x25   :  { %s44_s21 = sshll.u32 %s527_s20, 4  ;;  %p472_p2 = scmp.ne.s32.totalorder %s630_s3, %s471_s24  ;;  %s45_s21 = int_to_ptr.vmem [resolvable:$true] %s44_s21 }
  0x26   :  { %p475_p3 = scmp.lt.u32.totalorder %s471_s24, %s630_s3 }
  0x28   :  { %p477_p4 = pnand %p475_p3, %p472_p2 }
  0x2a   :  { %480 = shalt.err (!%p477_p4)
}
  0x2b   :  { %s481_s6 = scalar_lea.vmem %s45_s21, 1024  ;;  %p486_p6 = scmp.lt.s32.totalorder %s45_s21, %s45_s21 }
  0x2c   :  { %p482_p5 = scmp.ne.s32.totalorder %s45_s21, %s481_s6  ;;  %p487_p7 = scmp.lt.s32.totalorder %s481_s6, %s481_s6 }
  0x2e   :  { %p488_p8 = por %p487_p7, %p486_p6 }
  0x30   :  { %p489_p9 = pnand %p488_p8, %p482_p5 }
  0x32   :  { %492 = shalt.err (!%p489_p9)
}
  0x33   :  { %50 = dma.hbm_to_vmem [thread:$0]  %s630_s3, 1024, %s45_s21, [#allocation6], %s522_s28, %s522_s28, %s523_s29  }
  0x34   :  { %515 = dma.done.wait [#allocation3], 256  }
  0x35   :  { %516 = vsyncadd [#allocation3], 4294967040 }
  0x36   :  { %517 = dma.done.wait [#allocation6], 2048  }
  0x37   :  { %518 = vsyncadd [#allocation6], 4294965248  ;;  %v528_v0 = vmov 0.0   ;;  %vm529_vm0 = vmmov 0   ;;  %v407_v1 = vld [vmem:[#allocation5] sm:$0xff]   ;;  %v408_v2 = vld [vmem:[#allocation5 + $0x8] sm:$0xff]  }
  0x38   :  { %357 = vmatprep.subr.bf16.mxu0 %v528_v0  ;;  %373 = vmatprep.mubr.msk.bf16.mxu0 %vm529_vm0, %v528_v0  ;;  %v409_v3 = vld [vmem:[#allocation5 + $0x10] sm:$0xff]   ;;  %v415_v4 = vld [vmem:[#allocation7] sm:$0xff]   ;;  %v410_v5 = vld [vmem:[#allocation5 + $0x18] sm:$0xff]   ;;  %s530_s8 = smov [#allocation8]  }
  0x39   :  { %377 = vmatprep.subr.bf16.mxu1 %v528_v0  ;;  %393 = vmatprep.mubr.msk.bf16.mxu1 %vm529_vm0, %v528_v0  ;;  %v416_v6 = vld [vmem:[#allocation7 + $0x8] sm:$0xff]   ;;  %v411_v7 = vld [vmem:[#allocation5 + $0x20] sm:$0xff]   ;;  %v413_v9 = vld [vmem:[#allocation5 + $0x30] sm:$0xff]   ;;  %s308_s9 = sshll.u32 %s530_s8, 4  ;;  %s309_s9 = int_to_ptr.vmem [resolvable:$true] %s308_s9 }
  0x3a   :  { %358 = vmatpush3.bf16.msra.mxu0 %v407_v1  ;;  %378 = vmatpush3.bf16.msra.mxu1 %v415_v4  ;;  %v412_v8 = vld [vmem:[#allocation5 + $0x28] sm:$0xff]   ;;  %v414_v10 = vld [vmem:[#allocation5 + $0x38] sm:$0xff]   ;;  %v63_v11 = vld [vmem:[#allocation2] sm:$0xff]  ;;  %s493_s10 = scalar_lea.vmem %s309_s9, 256  ;;  %p498_p11 = scmp.lt.s32.totalorder %s309_s9, %s309_s9 }
  0x3b   :  { %359 = vmatprep.subr.bf16.mxu0 %v528_v0  ;;  %379 = vmatprep.subr.bf16.mxu1 %v528_v0  ;;  %v64_v12 = vld [vmem:[#allocation2 + $0x8] sm:$0xff]  ;;  %v417_v14 = vld [vmem:[#allocation7 + $0x10] sm:$0xff]   ;;  %v419_v16 = vld [vmem:[#allocation7 + $0x20] sm:$0xff]   ;;  %p494_p10 = scmp.ne.s32.totalorder %s309_s9, %s493_s10  ;;  %p499_p12 = scmp.lt.s32.totalorder %s493_s10, %s493_s10 }
  0x3c   :  { %v65_v13 = vpack.c.bf16 %v64_v12, %v63_v11  ;;  %v418_v15 = vld [vmem:[#allocation7 + $0x18] sm:$0xff]   ;;  %v420_v17 = vld [vmem:[#allocation7 + $0x28] sm:$0xff]   ;;  %v421_v18 = vld [vmem:[#allocation7 + $0x30] sm:$0xff]  }
  0x3d   :  { %v422_v19 = vld [vmem:[#allocation7 + $0x38] sm:$0xff]   ;;  %v321_v20 = vld [vmem:[%s629_s2] ss:$0 sm:$0xff]  ;;  %p500_p13 = por %p499_p12, %p498_p11 }
  0x3e   :  { %360 = vmatpush3.bf16.msra.mxu0 %v408_v2  ;;  %380 = vmatpush3.bf16.msra.mxu1 %v416_v6  ;;  %v330_v38 = vld [vmem:[%s631_s4] ss:$0 sm:$0xff] }
  0x3f   :  { %361 = vmatprep.subr.bf16.mxu0 %v528_v0  ;;  %381 = vmatprep.subr.bf16.mxu1 %v528_v0  ;;  %p501_p0 = pnand %p500_p13, %p494_p10 }
  0x42   :  { %362 = vmatpush3.bf16.msra.mxu0 %v409_v3  ;;  %382 = vmatpush3.bf16.msra.mxu1 %v417_v14 }
  0x43   :  { %363 = vmatprep.subr.bf16.mxu0 %v528_v0  ;;  %383 = vmatprep.subr.bf16.mxu1 %v528_v0 }
  0x46   :  { %364 = vmatpush3.bf16.msra.mxu0 %v410_v5  ;;  %384 = vmatpush3.bf16.msra.mxu1 %v418_v15 }
  0x47   :  { %365 = vmatprep.subr.bf16.mxu0 %v528_v0  ;;  %385 = vmatprep.subr.bf16.mxu1 %v528_v0 }
  0x4a   :  { %366 = vmatpush3.bf16.msra.mxu0 %v411_v7  ;;  %386 = vmatpush3.bf16.msra.mxu1 %v419_v16 }
  0x4b   :  { %367 = vmatprep.subr.bf16.mxu0 %v528_v0  ;;  %387 = vmatprep.subr.bf16.mxu1 %v528_v0 }
  0x4e   :  { %368 = vmatpush3.bf16.msra.mxu0 %v412_v8  ;;  %388 = vmatpush3.bf16.msra.mxu1 %v420_v17 }
  0x4f   :  { %369 = vmatprep.subr.bf16.mxu0 %v528_v0  ;;  %389 = vmatprep.subr.bf16.mxu1 %v528_v0 }
  0x52   :  { %370 = vmatpush3.bf16.msra.mxu0 %v413_v9  ;;  %390 = vmatpush3.bf16.msra.mxu1 %v421_v18 }
  0x53   :  { %371 = vmatprep.subr.bf16.mxu0 %v528_v0  ;;  %391 = vmatprep.subr.bf16.mxu1 %v528_v0 }
  0x56   :  { %372 = vmatpush3.bf16.msra.mxu0 %v414_v10  ;;  %392 = vmatpush3.bf16.msra.mxu1 %v422_v19 }
  0x59   :  { %374 = vmatmul.mubr.bf16.vlgmr.msra.gmra.mrb[0].mxu0 %v65_v13 }
 0x12c   :  { %v171_v21 = vpop.f32.mrb[0].mxu0 }
 0x12d   :  { %v172_v22 = vadd.f32 %v321_v20, %v171_v21  ;;  %v375_v23 = vpop.f32.mrb[1].mxu0 }
 0x12e   :  { %v174_v24 = vpop.f32.mrb[2].mxu0 }
 0x12f   :  { %v180_v25 = vmul.f32 0.70710677, %v172_v22  ;;  %v175_v26 = vadd.f32 %v321_v20, %v174_v24  ;;  %v376_v27 = vpop.f32.mrb[3].mxu0  ;;  %v178_v32 = vmul.f32 0.5, %v172_v22 }
 0x131   :  { %423 = verf.f32 %v180_v25  ;;  %v181_v28 = vmul.f32 0.70710677, %v175_v26  ;;  %v179_v33 = vmul.f32 0.5, %v175_v26 }
 0x133   :  { %425 = verf.f32 %v181_v28 }
 0x13b   :  { %v424_v29 = vpop.eup %423 }
 0x13c   :  { %v184_v30 = vadd.f32 1.0, %v424_v29 }
 0x13d   :  { %v426_v31 = vpop.eup %425 }
 0x13e   :  { %v185_v34 = vadd.f32 1.0, %v426_v31  ;;  %v186_v35 = vmul.f32 %v184_v30, %v178_v32 }
 0x140   :  { %v187_v36 = vmul.f32 %v185_v34, %v179_v33 }
 0x142   :  { %v188_v37 = vpack.c.bf16 %v187_v36, %v186_v35 }
 0x144   :  { %394 = vmatmul.mubr.bf16.vlgmr.msra.gmra.mrb[0].mxu1 %v188_v37 }
 0x217   :  { %v294_v39 = vpop.f32.mrb[0].mxu1 }
 0x218   :  { %v295_v40 = vadd.f32 %v330_v38, %v294_v39  ;;  %v395_v41 = vpop.f32.mrb[1].mxu1 }
 0x219   :  { %v297_v42 = vpop.f32.mrb[2].mxu1 }
 0x21a   :  { %301 = vst [vmem:[#allocation8] sm:$0xff] %v295_v40  ;;  %v298_v43 = vadd.f32 %v330_v38, %v297_v42  ;;  %v396_v44 = vpop.f32.mrb[3].mxu1 }
 0x21c   :  { %302 = vst [vmem:[#allocation8 + $0x8] sm:$0xff] %v298_v43 }
 0x21d   :  { %504 = shalt.err (!%p501_p0)
}
 0x21e   :  { %s505_s12 = scalar_lea.hbm %s632_s5, 256 }
 0x21f   :  { %p506_p1 = scmp.ne.s32.totalorder %s632_s5, %s505_s12  ;;  %p509_p2 = scmp.lt.u32.totalorder %s505_s12, %s632_s5 }
 0x221   :  { %p511_p3 = pnand %p509_p2, %p506_p1 }
 0x223   :  { %514 = shalt.err (!%p511_p3)
}
 0x224   :  { %314 = dma.vmem_to_hbm [thread:$0]  %s309_s9, 256, %s632_s5, [#allocation4], %s525_s1, %s525_s1, %s526_s17  }
 0x225   :  { %519 = dma.done.wait [#allocation4], 256  }
 0x226   :  { %520 = vsyncadd [#allocation4], 4294967040 }
 0x227   :  { %318 = vsyncpa [#allocation3], 1 }
 0x228   :  { %319 = vsyncpa [#allocation6], 1 }
 0x229   :  { %320 = vsyncpa [#allocation4], 1 }

</bundles_post_ra>
